<compile_context>
chip_gen: v7x
topology: tpu7x:2x2x1
jax: 0.10.0
libtpu: 0.0.40
codegen_flags: <defaults>
</compile_context>

<pallas_src>
from functools import partial

import numpy as np
import jax
import jax.numpy as jnp
from jax import lax
from jax.experimental import pallas as pl
from jax.experimental.pallas import tpu as pltpu

try:
    from scipy.optimize import linear_sum_assignment
except ImportError:  # pragma: no cover
    linear_sum_assignment = None  # TODO(synk): Hungarian solver unavailable without scipy; greedy fallback used.

# ---- cfg constants (deterministic, MaskFormer-style defaults) ----
ASSIGN_MASK_MASK = 20.0   # cfg.LOSS.AssignMaskMASK
ASSIGN_MASK_DICE = 1.0    # cfg.LOSS.AssignMaskDICE
ASM_HASMASK_CLS = 1.0     # cfg.ASM.HasMaskCls
ASM_HASMASK_MASK = 1.0    # cfg.ASM.HasMaskMask
ASM_NOMASK_CLS = 2.0      # cfg.ASM.NoMaskCls
ASM_NOMASK_MASK = 1.0     # cfg.ASM.NoMaskMask (multiplies an identically-zero term)
FOCAL_ALPHA = 0.25

PAD_LOGIT = -30.0         # HW padding for mask logits: sigmoid ~ 0, focal_neg ~ 0 -> pad adds nothing


def _round_up(n, m):
    return ((n + m - 1) // m) * m


def _vmem_limit_bytes():
    # Per-generation scoped-VMEM budget (v5e/v6e: 128 MiB physical, v7x: 64 MiB).
    try:
        cap = int(pltpu.get_tpu_info().vmem_capacity_bytes)
    except Exception:
        cap = 128 * 1024 * 1024
    return int(min(cap // 2, 32 * 1024 * 1024))


def _choose_q_tiling(Q, bs):
    # Query tiles are a 'parallel' grid dim: when bs == 1 split Q in two so both v7x
    # TensorCores get work.  Keep every tile a multiple of 16 (bf16 sublane packing).
    tq = _round_up(max(Q, 1), 16)
    if bs >= 2 or tq <= 16:
        return tq, tq                      # (Qp, TQ): single q tile
    half = _round_up(-(-tq // 2), 16)
    return 2 * half, half


def _choose_hw_tiling(HW, TQ, Tp, bytes_per_el=2):
    # tk sized from the per-generation VMEM budget: double-buffered bf16 (TQ,tk)+(Tp,tk)
    # streaming windows, leaving ~8 MiB for accumulators / small operands / compiler scratch.
    limit = _vmem_limit_bytes()
    stream = max(limit - 8 * 1024 * 1024, 4 * 1024 * 1024)
    tk_cap = stream // (2 * (TQ + Tp) * bytes_per_el)
    tk_cap = max(512, (tk_cap // 512) * 512)
    tk = int(min(8192, tk_cap))
    if HW <= tk:
        tk = _round_up(HW, 128)
        return tk, tk
    return tk, _round_up(HW, tk)


def _make_cost_kernel(inv_hw):
    def kernel(logits_ref, masks_ref, tmask_ref, onehot_ref, hasmask_ref, sumt_ref,
               cost_ref, facc_ref, dacc_ref, fneg_ref, sump_ref):
        k = pl.program_id(2)

        @pl.when(k == 0)
        def _init():
            facc_ref[...] = jnp.zeros_like(facc_ref)
            dacc_ref[...] = jnp.zeros_like(dacc_ref)
            fneg_ref[...] = jnp.zeros_like(fneg_ref)
            sump_ref[...] = jnp.zeros_like(sump_ref)

        x = masks_ref[0].astype(jnp.float32)     # (TQ, tk) bf16 mask logits -> f32
        t = tmask_ref[0]                         # (Tp, tk) bf16 binary targets ({0,1} exact)

        # ---- shared transcendentals: one exp + one log + one approx-recip per element ----
        e = jnp.exp(-jnp.abs(x))
        one_p_e = 1.0 + e
        l = jnp.log(one_p_e)
        # sigmoid(x); approx reciprocal runs on the otherwise-idle EUP slot
        p = jnp.where(x >= 0.0, 1.0, e) * pl.reciprocal(one_p_e, approx=True)
        sp_neg = jnp.maximum(-x, 0.0) + l        # softplus(-x) = BCE(target=1)
        sp_pos = sp_neg + x                      # softplus(x)  = BCE(target=0)
        one_m_p = 1.0 - p
        q2sp = (p * p) * sp_pos                  # focal_neg / (1 - alpha)
        # focal_pos - focal_neg, alpha-scaling folded to save a per-element multiply
        focal_diff = FOCAL_ALPHA * ((one_m_p * one_m_p) * sp_neg + q2sp) - q2sp

        # ---- two MXU matmuls sharing the streamed target tile (no concatenate copy) ----
        # focal term kept f32 end-to-end (cancellation-sensitive); dice numerator in bf16.
        facc_ref[...] += lax.dot_general(
            focal_diff, t.astype(jnp.float32), (((1,), (1,)), ((), ())),
            preferred_element_type=jnp.float32)
        dacc_ref[...] += lax.dot_general(
            p.astype(jnp.bfloat16), t, (((1,), (1,)), ((), ())),
            preferred_element_type=jnp.float32)

        # per-query row sums (XLU reductions on an otherwise idle unit)
        fneg_ref[...] += jnp.sum(q2sp, axis=-1, keepdims=True)   # rowsum(focal_neg)/(1-alpha)
        sump_ref[...] += jnp.sum(p, axis=-1, keepdims=True)      # rowsum(sigmoid(x))

        @pl.when(k == pl.num_programs(2) - 1)
        def _finalize():
            # class cost (once per (b, q) tile): -softmax(logits) gathered via one-hot matmul
            logits = logits_ref[0]               # (TQ, C)
            oh = onehot_ref[0]                   # (Tp, C)
            z = logits - jnp.max(logits, axis=-1, keepdims=True)
            ez = jnp.exp(z)
            prob = ez / jnp.sum(ez, axis=-1, keepdims=True)
            cls_cost = -lax.dot_general(prob, oh, (((1,), (1,)), ((), ())),
                                        preferred_element_type=jnp.float32)

            # focal_neg @ (1 - t).T == rowsum(focal_neg) - focal_neg @ t.T  (fused into facc)
            fneg_row = (1.0 - FOCAL_ALPHA) * fneg_ref[...]
            focal_cost = (facc_ref[...] + fneg_row) * inv_hw
            sum_t = sumt_ref[0]                  # (1, Tp) host-precomputed target pixel counts
            dice_cost = 1.0 - (2.0 * dacc_ref[...] + 1.0) / (sump_ref[...] + sum_t + 1.0)
            mask_cost = ASSIGN_MASK_MASK * focal_cost + ASSIGN_MASK_DICE * dice_cost

            hm = hasmask_ref[0]                  # (1, Tp)
            cls_w = hm * ASM_HASMASK_CLS + (1.0 - hm) * ASM_NOMASK_CLS
            # nomask mask cost is 0 * batch_mask_loss_novel(...) == 0, so only cls survives there.
            cost_ref[0] = cls_cost * cls_w + hm * (ASM_HASMASK_MASK * mask_cost)

    return kernel


@partial(jax.jit, static_argnames=("Qp", "TQ", "tk", "HWp", "hw_real"))
def compute_cost_matrices(pred_logits, pred_masks, tgt_masks, tgt_onehot, hasmask, sum_t,
                          *, Qp, TQ, tk, HWp, hw_real):
    # pred_logits: (bs, Q, C) f32, pred_masks: (bs, Q, H, W) f32 — padded & cast ON DEVICE.
    bs, Q, C = pred_logits.shape
    H, W = pred_masks.shape[-2:]
    HW = H * W
    Tp = tgt_masks.shape[1]
    nk = HWp // tk

    logits_p = jnp.pad(pred_logits.astype(jnp.float32), ((0, 0), (0, Qp - Q), (0, 0)))
    masks_p = jnp.pad(pred_masks.reshape(bs, Q, HW).astype(jnp.float32),
                      ((0, 0), (0, Qp - Q), (0, HWp - HW)),
                      constant_values=PAD_LOGIT).astype(jnp.bfloat16)

    kernel = _make_cost_kernel(1.0 / float(hw_real))
    return pl.pallas_call(
        kernel,
        out_shape=jax.ShapeDtypeStruct((bs, Qp, Tp), jnp.float32),
        grid_spec=pltpu.PrefetchScalarGridSpec(
            num_scalar_prefetch=0,
            grid=(bs, Qp // TQ, nk),                 # batch & q-tile parallel, HW reduction last
            in_specs=[
                pl.BlockSpec((1, TQ, C), lambda b, q, k: (b, q, 0)),
                pl.BlockSpec((1, TQ, tk), lambda b, q, k: (b, q, k)),
                pl.BlockSpec((1, Tp, tk), lambda b, q, k: (b, 0, k)),
                pl.BlockSpec((1, Tp, C), lambda b, q, k: (b, 0, 0)),
                pl.BlockSpec((1, 1, Tp), lambda b, q, k: (b, 0, 0)),
                pl.BlockSpec((1, 1, Tp), lambda b, q, k: (b, 0, 0)),
            ],
            out_specs=pl.BlockSpec((1, TQ, Tp), lambda b, q, k: (b, q, 0)),
            scratch_shapes=[
                pltpu.VMEM((TQ, Tp), jnp.float32),   # (focal_pos - focal_neg) @ t.T
                pltpu.VMEM((TQ, Tp), jnp.float32),   # sigmoid(x) @ t.T   (dice numerator / 2)
                pltpu.VMEM((TQ, 1), jnp.float32),    # rowsum(p^2 * softplus(x))
                pltpu.VMEM((TQ, 1), jnp.float32),    # rowsum(sigmoid(x))
            ]),
        compiler_params=pltpu.CompilerParams(
            dimension_semantics=("parallel", "parallel", "arbitrary"),
            vmem_limit_bytes=_vmem_limit_bytes()),
    )(logits_p, masks_p, tgt_masks, tgt_onehot, hasmask, sum_t)


def _nearest_resize(masks, H, W):
    # exact reproduction of F.interpolate(mode='nearest'): src = floor(dst * in/out)
    h0, w0 = masks.shape[-2:]
    ri = (np.arange(H) * h0) // H
    ci = (np.arange(W) * w0) // W
    return masks[:, ri][:, :, ci]


def prepare_targets(targets, H, W, C, TQ):
    # Host-side per-image preprocessing (variable-length targets, nearest resize, hasmask
    # permutation, one-hot labels, per-target pixel counts).  Predictions stay on device.
    bs = len(targets)
    HW = H * W
    t_list, oh_list, hm_list, st_list, perms, t_counts = [], [], [], [], [], []
    for b in range(bs):
        tm = _nearest_resize(np.asarray(targets[b]['masks'], np.float32), H, W)  # (T, H, W)
        labels = np.asarray(targets[b]['labels'], np.int64)
        hasmask = tm.mean(axis=(1, 2)) != 0
        # torch.cat((hasmask_cols, nomask_cols), dim=1): columns reordered hasmask-first
        perm = np.concatenate([np.nonzero(hasmask)[0], np.nonzero(~hasmask)[0]])
        tflat = tm[perm].reshape(len(perm), HW)
        t_list.append(tflat)
        oh_list.append(np.eye(C, dtype=np.float32)[labels[perm]])
        hm_list.append(hasmask[perm].astype(np.float32))
        st_list.append(tflat.sum(axis=1).astype(np.float32))
        perms.append(perm)
        t_counts.append(len(perm))

    Tp = _round_up(max(max(t_counts), 1), 128)     # lane-dense target axis
    tk, HWp = _choose_hw_tiling(HW, TQ, Tp)

    tmask_p = np.zeros((bs, Tp, HWp), np.float32)
    onehot_p = np.zeros((bs, Tp, C), np.float32)
    hm_p = np.zeros((bs, 1, Tp), np.float32)
    st_p = np.zeros((bs, 1, Tp), np.float32)
    for b in range(bs):
        Tb = t_counts[b]
        tmask_p[b, :Tb, :HW] = t_list[b]
        onehot_p[b, :Tb] = oh_list[b]
        hm_p[b, 0, :Tb] = hm_list[b]
        st_p[b, 0, :Tb] = st_list[b]

    arrays = (jnp.asarray(tmask_p, jnp.bfloat16),  # {0,1} exact in bf16 -> half the DMA bytes
              jnp.asarray(onehot_p), jnp.asarray(hm_p), jnp.asarray(st_p))
    meta = dict(HW=HW, tk=tk, HWp=HWp, Tp=Tp, t_counts=t_counts, perms=perms,
                unpadded=dict(tmask=t_list, onehot=oh_list, hasmask=hm_list))
    return arrays, meta


def reference_cost_single(logits, masks_flat, tmask_flat, onehot, hasmask):
    # f64 numpy reference of the original (unfused) math, one batch element
    logits = np.asarray(logits, np.float64)
    x = np.asarray(masks_flat, np.float64)
    t = np.asarray(tmask_flat, np.float64)
    oh = np.asarray(onehot, np.float64)
    hm = np.asarray(hasmask, np.float64)[None, :]

    z = logits - logits.max(-1, keepdims=True)
    prob = np.exp(z)
    prob /= prob.sum(-1, keepdims=True)
    cls_cost = -prob @ oh.T

    p = 1.0 / (1.0 + np.exp(-x))
    sp_pos = np.maximum(-x, 0) + np.log(1.0 + np.exp(-np.abs(x)))   # softplus(-x)
    sp_neg = np.maximum(x, 0) + np.log(1.0 + np.exp(-np.abs(x)))    # softplus(x)
    focal_pos = FOCAL_ALPHA * (1.0 - p) ** 2 * sp_pos
    focal_neg = (1.0 - FOCAL_ALPHA) * p ** 2 * sp_neg
    hw = x.shape[-1]
    focal = (focal_pos @ t.T + focal_neg @ (1.0 - t).T) / hw
    num = 2.0 * (p @ t.T)
    den = p.sum(-1)[:, None] + t.sum(-1)[None, :]
    dice = 1.0 - (num + 1.0) / (den + 1.0)
    mask_cost = ASSIGN_MASK_MASK * focal + ASSIGN_MASK_DICE * dice
    return hm * (ASM_HASMASK_CLS * cls_cost + ASM_HASMASK_MASK * mask_cost) \
        + (1.0 - hm) * (ASM_NOMASK_CLS * cls_cost)


def prop_hungarian_matcher(outputs, targets):
    pred_logits = jnp.asarray(outputs['pred_logits'], jnp.float32)   # (bs, Q, C)
    pred_masks = jnp.asarray(outputs['pred_masks'], jnp.float32)     # (bs, Q, H, W)
    bs, Q, C = pred_logits.shape
    H, W = pred_masks.shape[-2:]

    Qp, TQ = _choose_q_tiling(Q, bs)
    (tmask_b, onehot, hm, sumt), meta = prepare_targets(targets, H, W, C, TQ)

    cost = compute_cost_matrices(pred_logits, pred_masks, tmask_b, onehot, hm, sumt,
                                 Qp=Qp, TQ=TQ, tk=meta['tk'], HWp=meta['HWp'],
                                 hw_real=meta['HW'])
    cost_np = np.asarray(jax.block_until_ready(cost))

    indices = []
    for b in range(bs):
        cb = cost_np[b, :Q, :meta['t_counts'][b]]   # strip Q/T padding before the assignment
        if linear_sum_assignment is not None:
            i, j = linear_sum_assignment(cb)
        else:
            # TODO(synk): Hungarian assignment has no Pallas/JAX equivalent; greedy per-column fallback.
            j = np.arange(cb.shape[1])
            i = cb.argmin(axis=0)
        # column indices j are in the permuted (hasmask-first) target order,
        # exactly like the reference module's torch.cat-based cost matrix.
        indices.append((np.asarray(i, np.int64), np.asarray(j, np.int64)))
    return indices, cost_np, meta


if __name__ == "__main__":
    key = jax.random.PRNGKey(0)
    bs, Q, C, H, W, T = 2, 16, 8, 16, 16, 8
    k1, k2, k3, k4 = jax.random.split(key, 4)

    pred_logits = jax.random.normal(k1, (bs, Q, C), dtype=jnp.float32)
    pred_masks = jax.random.normal(k2, (bs, Q, H, W), dtype=jnp.float32)
    # target masks at half resolution (exercise the nearest-interp path);
    # the last 2 targets per batch are empty -> exercise the "nomask" branch.
    tmask_lo = (jax.random.uniform(k3, (bs, T, H // 2, W // 2)) > 0.5).astype(jnp.float32)
    tmask_lo = tmask_lo.at[:, -2:].set(0.0)
    labels = jax.random.randint(k4, (bs, T), 0, C)

    outputs = {'pred_logits': pred_logits, 'pred_masks': pred_masks}
    targets = [{'labels': np.asarray(labels[b]), 'masks': np.asarray(tmask_lo[b])} for b in range(bs)]

    indices, cost_np, meta = prop_hungarian_matcher(outputs, targets)

    # correctness: f64 numpy reference of the unfused math, evaluated on the bf16-quantized
    # mask logits (the deliberate streaming dtype) so the check isolates kernel-math error.
    logits_np = np.asarray(pred_logits)
    masks_bf16 = np.asarray(jnp.asarray(pred_masks, jnp.bfloat16).astype(jnp.float32)
                            ).reshape(bs, Q, H * W)
    un = meta['unpadded']
    for b in range(bs):
        Tb = meta['t_counts'][b]
        ref = reference_cost_single(logits_np[b], masks_bf16[b],
                                    un['tmask'][b], un['onehot'][b], un['hasmask'][b])
        np.testing.assert_allclose(cost_np[b, :Q, :Tb], ref, rtol=5e-3, atol=5e-3)

    assert len(indices) == bs and all(len(i) == len(j) for i, j in indices)
    print("KERNEL_OK")
</pallas_src>

<mosaic_0001>
module attributes {stable_mosaic.version = 11 : i64} {
  func.func @kernel(%arg0: i32, %arg1: i32, %arg2: i32, %arg3: memref<1x16x8xf32, #tpu.memory_space<vmem>>, %arg4: memref<1x16x256xbf16, #tpu.memory_space<vmem>>, %arg5: memref<1x128x256xbf16, #tpu.memory_space<vmem>>, %arg6: memref<1x128x8xf32, #tpu.memory_space<vmem>>, %arg7: memref<1x1x128xf32, #tpu.memory_space<vmem>>, %arg8: memref<1x1x128xf32, #tpu.memory_space<vmem>>, %arg9: memref<1x16x128xf32, #tpu.memory_space<vmem>>, %arg10: memref<16x128xf32, #tpu.memory_space<vmem>>, %arg11: memref<16x128xf32, #tpu.memory_space<vmem>>, %arg12: memref<16x1xf32, #tpu.memory_space<vmem>>, %arg13: memref<16x1xf32, #tpu.memory_space<vmem>>) attributes {dimension_semantics = [#tpu.dimension_semantics<parallel>, #tpu.dimension_semantics<parallel>, #tpu.dimension_semantics<arbitrary>], iteration_bounds = array<i64: 2, 1, 1>, scalar_prefetch = 0 : i64, scratch_operands = 4 : i64, tpu.core_type = #tpu.core_type<tc>, window_params = [{transform_indices = @transform_0, window_bounds = array<i64: 1, 16, 8>}, {transform_indices = @transform_1, window_bounds = array<i64: 1, 16, 256>}, {transform_indices = @transform_2, window_bounds = array<i64: 1, 128, 256>}, {transform_indices = @transform_3, window_bounds = array<i64: 1, 128, 8>}, {transform_indices = @transform_4, window_bounds = array<i64: 1, 1, 128>}, {transform_indices = @transform_5, window_bounds = array<i64: 1, 1, 128>}, {transform_indices = @transform_6, window_bounds = array<i64: 1, 16, 128>}]} {
    %c0_i32 = arith.constant 0 : i32
    %0 = arith.cmpi eq, %arg2, %c0_i32 : i32
    %1 = arith.extui %0 : i1 to i32
    %c0_i32_0 = arith.constant 0 : i32
    %2 = arith.cmpi ne, %1, %c0_i32_0 : i32
    scf.if %2 {
      %cst_35 = arith.constant 0.000000e+00 : f32
      %60 = vector.broadcast %cst_35 : f32 to vector<16x128xf32>
      %c0_36 = arith.constant 0 : index
      %c0_37 = arith.constant 0 : index
      %61 = vector.load %arg10[%c0_36, %c0_37] : memref<16x128xf32, #tpu.memory_space<vmem>>, vector<16x128xf32>
      tpu.vector_store %arg10[%c0_36, %c0_37], %60 {strides = array<i32>} : memref<16x128xf32, #tpu.memory_space<vmem>>, vector<16x128xf32>,
      %cst_38 = arith.constant 0.000000e+00 : f32
      %62 = vector.broadcast %cst_38 : f32 to vector<16x128xf32>
      %c0_39 = arith.constant 0 : index
      %c0_40 = arith.constant 0 : index
      %63 = vector.load %arg11[%c0_39, %c0_40] : memref<16x128xf32, #tpu.memory_space<vmem>>, vector<16x128xf32>
      tpu.vector_store %arg11[%c0_39, %c0_40], %62 {strides = array<i32>} : memref<16x128xf32, #tpu.memory_space<vmem>>, vector<16x128xf32>,
      %cst_41 = arith.constant 0.000000e+00 : f32
      %64 = vector.broadcast %cst_41 : f32 to vector<16x1xf32>
      %c0_42 = arith.constant 0 : index
      %c0_43 = arith.constant 0 : index
      %65 = vector.load %arg12[%c0_42, %c0_43] : memref<16x1xf32, #tpu.memory_space<vmem>>, vector<16x1xf32>
      tpu.vector_store %arg12[%c0_42, %c0_43], %64 {strides = array<i32>} : memref<16x1xf32, #tpu.memory_space<vmem>>, vector<16x1xf32>,
      %cst_44 = arith.constant 0.000000e+00 : f32
      %66 = vector.broadcast %cst_44 : f32 to vector<16x1xf32>
      %c0_45 = arith.constant 0 : index
      %c0_46 = arith.constant 0 : index
      %67 = vector.load %arg13[%c0_45, %c0_46] : memref<16x1xf32, #tpu.memory_space<vmem>>, vector<16x1xf32>
      tpu.vector_store %arg13[%c0_45, %c0_46], %66 {strides = array<i32>} : memref<16x1xf32, #tpu.memory_space<vmem>>, vector<16x1xf32>,
    } else {
    }
    %c0 = arith.constant 0 : index
    %c0_1 = arith.constant 0 : index
    %c0_2 = arith.constant 0 : index
    %3 = vector.load %arg4[%c0, %c0_1, %c0_2] : memref<1x16x256xbf16, #tpu.memory_space<vmem>>, vector<1x16x256xbf16>
    %4 = vector.shape_cast %3 : vector<1x16x256xbf16> to vector<16x256xbf16>
    %5 = arith.extf %4 : vector<16x256xbf16> to vector<16x256xf32>
    %c0_3 = arith.constant 0 : index
    %c0_4 = arith.constant 0 : index
    %c0_5 = arith.constant 0 : index
    %6 = vector.load %arg5[%c0_3, %c0_4, %c0_5] : memref<1x128x256xbf16, #tpu.memory_space<vmem>>, vector<1x128x256xbf16>
    %7 = vector.shape_cast %6 : vector<1x128x256xbf16> to vector<128x256xbf16>
    %8 = math.absf %5 : vector<16x256xf32>
    %cst = arith.constant 0.000000e+00 : f32
    %9 = vector.broadcast %cst : f32 to vector<16x256xf32>
    %10 = arith.subf %9, %8 : vector<16x256xf32>
    %11 = math.exp %10 : vector<16x256xf32>
    %cst_6 = arith.constant 1.000000e+00 : f32
    %12 = vector.broadcast %cst_6 : f32 to vector<16x256xf32>
    %13 = arith.addf %12, %11 : vector<16x256xf32>
    %14 = math.log %13 : vector<16x256xf32>
    %cst_7 = arith.constant 0.000000e+00 : f32
    %15 = vector.broadcast %cst_7 : f32 to vector<16x256xf32>
    %16 = arith.cmpf oge, %5, %15 : vector<16x256xf32>
    %cst_8 = arith.constant 1.000000e+00 : f32
    %17 = vector.broadcast %cst_8 : f32 to vector<16x256xf32>
    %18 = arith.select %16, %17, %11 : vector<16x256xi1>, vector<16x256xf32>
    %19 = tpu.reciprocal %13 {approx = true} : vector<16x256xf32> -> vector<16x256xf32>
    %20 = arith.mulf %18, %19 : vector<16x256xf32>
    %cst_9 = arith.constant 0.000000e+00 : f32
    %21 = vector.broadcast %cst_9 : f32 to vector<16x256xf32>
    %22 = arith.subf %21, %5 : vector<16x256xf32>
    %cst_10 = arith.constant 0.000000e+00 : f32
    %23 = vector.broadcast %cst_10 : f32 to vector<16x256xf32>
    %24 = arith.maximumf %22, %23 : vector<16x256xf32>
    %25 = arith.addf %24, %14 : vector<16x256xf32>
    %26 = arith.addf %25, %5 : vector<16x256xf32>
    %cst_11 = arith.constant 1.000000e+00 : f32
    %27 = vector.broadcast %cst_11 : f32 to vector<16x256xf32>
    %28 = arith.subf %27, %20 : vector<16x256xf32>
    %29 = arith.mulf %20, %20 : vector<16x256xf32>
    %30 = arith.mulf %29, %26 : vector<16x256xf32>
    %31 = arith.mulf %28, %28 : vector<16x256xf32>
    %32 = arith.mulf %31, %25 : vector<16x256xf32>
    %33 = arith.addf %32, %30 : vector<16x256xf32>
    %cst_12 = arith.constant 2.500000e-01 : f32
    %34 = vector.broadcast %cst_12 : f32 to vector<16x256xf32>
    %35 = arith.mulf %34, %33 : vector<16x256xf32>
    %36 = arith.subf %35, %30 : vector<16x256xf32>
    %c0_13 = arith.constant 0 : index
    %c0_14 = arith.constant 0 : index
    %37 = vector.load %arg10[%c0_13, %c0_14] : memref<16x128xf32, #tpu.memory_space<vmem>>, vector<16x128xf32>
    %38 = arith.extf %7 : vector<128x256xbf16> to vector<128x256xf32>
    %cst_15 = arith.constant dense<0.000000e+00> : vector<16x128xf32>
    %39 = tpu.matmul %36, %38, %cst_15 {dimension_numbers = #tpu.dot_dimension_numbers<[1], [1], [0], [0], [0, 0, 1, 0], [], []>} : vector<16x256xf32>, vector<128x256xf32>, vector<16x128xf32> -> vector<16x128xf32>
    %40 = arith.addf %37, %39 : vector<16x128xf32>
    %c0_16 = arith.constant 0 : index
    %c0_17 = arith.constant 0 : index
    %41 = vector.load %arg10[%c0_16, %c0_17] : memref<16x128xf32, #tpu.memory_space<vmem>>, vector<16x128xf32>
    tpu.vector_store %arg10[%c0_16, %c0_17], %40 {strides = array<i32>} : memref<16x128xf32, #tpu.memory_space<vmem>>, vector<16x128xf32>,
    %c0_18 = arith.constant 0 : index
    %c0_19 = arith.constant 0 : index
    %42 = vector.load %arg11[%c0_18, %c0_19] : memref<16x128xf32, #tpu.memory_space<vmem>>, vector<16x128xf32>
    %43 = arith.truncf %20 : vector<16x256xf32> to vector<16x256xbf16>
    %cst_20 = arith.constant dense<0.000000e+00> : vector<16x128xf32>
    %44 = tpu.matmul %43, %7, %cst_20 {dimension_numbers = #tpu.dot_dimension_numbers<[1], [1], [0], [0], [0, 0, 1, 0], [], []>} : vector<16x256xbf16>, vector<128x256xbf16>, vector<16x128xf32> -> vector<16x128xf32>
    %45 = arith.addf %42, %44 : vector<16x128xf32>
    %c0_21 = arith.constant 0 : index
    %c0_22 = arith.constant 0 : index
    %46 = vector.load %arg11[%c0_21, %c0_22] : memref<16x128xf32, #tpu.memory_space<vmem>>, vector<16x128xf32>
    tpu.vector_store %arg11[%c0_21, %c0_22], %45 {strides = array<i32>} : memref<16x128xf32, #tpu.memory_space<vmem>>, vector<16x128xf32>,
    %c0_23 = arith.constant 0 : index
    %c0_24 = arith.constant 0 : index
    %47 = vector.load %arg12[%c0_23, %c0_24] : memref<16x1xf32, #tpu.memory_space<vmem>>, vector<16x1xf32>
    %cst_25 = arith.constant dense<0.000000e+00> : vector<16xf32>
    %48 = vector.multi_reduction <add>, %30, %cst_25 [1] : vector<16x256xf32> to vector<16xf32>
    %49 = vector.shape_cast %48 : vector<16xf32> to vector<16x1xf32>
    %50 = arith.addf %47, %49 : vector<16x1xf32>
    %c0_26 = arith.constant 0 : index
    %c0_27 = arith.constant 0 : index
    %51 = vector.load %arg12[%c0_26, %c0_27] : memref<16x1xf32, #tpu.memory_space<vmem>>, vector<16x1xf32>
    tpu.vector_store %arg12[%c0_26, %c0_27], %50 {strides = array<i32>} : memref<16x1xf32, #tpu.memory_space<vmem>>, vector<16x1xf32>,
    %c0_28 = arith.constant 0 : index
    %c0_29 = arith.constant 0 : index
    %52 = vector.load %arg13[%c0_28, %c0_29] : memref<16x1xf32, #tpu.memory_space<vmem>>, vector<16x1xf32>
    %cst_30 = arith.constant dense<0.000000e+00> : vector<16xf32>
    %53 = vector.multi_reduction <add>, %20, %cst_30 [1] : vector<16x256xf32> to vector<16xf32>
    %54 = vector.shape_cast %53 : vector<16xf32> to vector<16x1xf32>
    %55 = arith.addf %52, %54 : vector<16x1xf32>
    %c0_31 = arith.constant 0 : index
    %c0_32 = arith.constant 0 : index
    %56 = vector.load %arg13[%c0_31, %c0_32] : memref<16x1xf32, #tpu.memory_space<vmem>>, vector<16x1xf32>
    tpu.vector_store %arg13[%c0_31, %c0_32], %55 {strides = array<i32>} : memref<16x1xf32, #tpu.memory_space<vmem>>, vector<16x1xf32>,
    %c0_i32_33 = arith.constant 0 : i32
    %57 = arith.cmpi eq, %arg2, %c0_i32_33 : i32
    %58 = arith.extui %57 : i1 to i32
    %c0_i32_34 = arith.constant 0 : i32
    %59 = arith.cmpi ne, %58, %c0_i32_34 : i32
    scf.if %59 {
      %c0_35 = arith.constant 0 : index
      %c0_36 = arith.constant 0 : index
      %c0_37 = arith.constant 0 : index
      %60 = vector.load %arg3[%c0_35, %c0_36, %c0_37] : memref<1x16x8xf32, #tpu.memory_space<vmem>>, vector<1x16x8xf32>
      %61 = vector.shape_cast %60 : vector<1x16x8xf32> to vector<16x8xf32>
      %c0_38 = arith.constant 0 : index
      %c0_39 = arith.constant 0 : index
      %c0_40 = arith.constant 0 : index
      %62 = vector.load %arg6[%c0_38, %c0_39, %c0_40] : memref<1x128x8xf32, #tpu.memory_space<vmem>>, vector<1x128x8xf32>
      %63 = vector.shape_cast %62 : vector<1x128x8xf32> to vector<128x8xf32>
      %cst_41 = arith.constant dense<0xFF800000> : vector<16xf32>
      %64 = vector.multi_reduction <maximumf>, %61, %cst_41 [1] : vector<16x8xf32> to vector<16xf32>
      %65 = vector.shape_cast %64 : vector<16xf32> to vector<16x1xf32>
      %66 = vector.broadcast %65 : vector<16x1xf32> to vector<16x8xf32>
      %67 = arith.subf %61, %66 : vector<16x8xf32>
      %68 = math.exp %67 : vector<16x8xf32>
      %cst_42 = arith.constant dense<0.000000e+00> : vector<16xf32>
      %69 = vector.multi_reduction <add>, %68, %cst_42 [1] : vector<16x8xf32> to vector<16xf32>
      %70 = vector.shape_cast %69 : vector<16xf32> to vector<16x1xf32>
      %71 = vector.broadcast %70 : vector<16x1xf32> to vector<16x8xf32>
      %72 = arith.divf %68, %71 : vector<16x8xf32>
      %cst_43 = arith.constant dense<0.000000e+00> : vector<16x128xf32>
      %73 = tpu.matmul %72, %63, %cst_43 {dimension_numbers = #tpu.dot_dimension_numbers<[1], [1], [0], [0], [0, 0, 1, 0], [], []>} : vector<16x8xf32>, vector<128x8xf32>, vector<16x128xf32> -> vector<16x128xf32>
      %cst_44 = arith.constant 0.000000e+00 : f32
      %74 = vector.broadcast %cst_44 : f32 to vector<16x128xf32>
      %75 = arith.subf %74, %73 : vector<16x128xf32>
      %c0_45 = arith.constant 0 : index
      %c0_46 = arith.constant 0 : index
      %76 = vector.load %arg12[%c0_45, %c0_46] : memref<16x1xf32, #tpu.memory_space<vmem>>, vector<16x1xf32>
      %cst_47 = arith.constant 7.500000e-01 : f32
      %77 = vector.broadcast %cst_47 : f32 to vector<16x1xf32>
      %78 = arith.mulf %77, %76 : vector<16x1xf32>
      %c0_48 = arith.constant 0 : index
      %c0_49 = arith.constant 0 : index
      %79 = vector.load %arg10[%c0_48, %c0_49] : memref<16x128xf32, #tpu.memory_space<vmem>>, vector<16x128xf32>
      %80 = vector.broadcast %78 : vector<16x1xf32> to vector<16x128xf32>
      %81 = arith.addf %79, %80 : vector<16x128xf32>
      %cst_50 = arith.constant 3.906250e-03 : f32
      %82 = vector.broadcast %cst_50 : f32 to vector<16x128xf32>
      %83 = arith.mulf %81, %82 : vector<16x128xf32>
      %c0_51 = arith.constant 0 : index
      %c0_52 = arith.constant 0 : index
      %c0_53 = arith.constant 0 : index
      %84 = vector.load %arg8[%c0_51, %c0_52, %c0_53] : memref<1x1x128xf32, #tpu.memory_space<vmem>>, vector<1x1x128xf32>
      %85 = vector.shape_cast %84 : vector<1x1x128xf32> to vector<1x128xf32>
      %c0_54 = arith.constant 0 : index
      %c0_55 = arith.constant 0 : index
      %86 = vector.load %arg11[%c0_54, %c0_55] : memref<16x128xf32, #tpu.memory_space<vmem>>, vector<16x128xf32>
      %cst_56 = arith.constant 2.000000e+00 : f32
      %87 = vector.broadcast %cst_56 : f32 to vector<16x128xf32>
      %88 = arith.mulf %87, %86 : vector<16x128xf32>
      %cst_57 = arith.constant 1.000000e+00 : f32
      %89 = vector.broadcast %cst_57 : f32 to vector<16x128xf32>
      %90 = arith.addf %88, %89 : vector<16x128xf32>
      %c0_58 = arith.constant 0 : index
      %c0_59 = arith.constant 0 : index
      %91 = vector.load %arg13[%c0_58, %c0_59] : memref<16x1xf32, #tpu.memory_space<vmem>>, vector<16x1xf32>
      %92 = vector.broadcast %91 : vector<16x1xf32> to vector<16x128xf32>
      %93 = vector.broadcast %85 : vector<1x128xf32> to vector<16x128xf32>
      %94 = arith.addf %92, %93 : vector<16x128xf32>
      %cst_60 = arith.constant 1.000000e+00 : f32
      %95 = vector.broadcast %cst_60 : f32 to vector<16x128xf32>
      %96 = arith.addf %94, %95 : vector<16x128xf32>
      %97 = arith.divf %90, %96 : vector<16x128xf32>
      %cst_61 = arith.constant 1.000000e+00 : f32
      %98 = vector.broadcast %cst_61 : f32 to vector<16x128xf32>
      %99 = arith.subf %98, %97 : vector<16x128xf32>
      %cst_62 = arith.constant 2.000000e+01 : f32
      %100 = vector.broadcast %cst_62 : f32 to vector<16x128xf32>
      %101 = arith.mulf %100, %83 : vector<16x128xf32>
      %cst_63 = arith.constant 1.000000e+00 : f32
      %102 = vector.broadcast %cst_63 : f32 to vector<16x128xf32>
      %103 = arith.mulf %102, %99 : vector<16x128xf32>
      %104 = arith.addf %101, %103 : vector<16x128xf32>
      %c0_64 = arith.constant 0 : index
      %c0_65 = arith.constant 0 : index
      %c0_66 = arith.constant 0 : index
      %105 = vector.load %arg7[%c0_64, %c0_65, %c0_66] : memref<1x1x128xf32, #tpu.memory_space<vmem>>, vector<1x1x128xf32>
      %106 = vector.shape_cast %105 : vector<1x1x128xf32> to vector<1x128xf32>
      %cst_67 = arith.constant 1.000000e+00 : f32
      %107 = vector.broadcast %cst_67 : f32 to vector<1x128xf32>
      %108 = arith.mulf %106, %107 : vector<1x128xf32>
      %cst_68 = arith.constant 1.000000e+00 : f32
      %109 = vector.broadcast %cst_68 : f32 to vector<1x128xf32>
      %110 = arith.subf %109, %106 : vector<1x128xf32>
      %cst_69 = arith.constant 2.000000e+00 : f32
      %111 = vector.broadcast %cst_69 : f32 to vector<1x128xf32>
      %112 = arith.mulf %110, %111 : vector<1x128xf32>
      %113 = arith.addf %108, %112 : vector<1x128xf32>
      %114 = vector.broadcast %113 : vector<1x128xf32> to vector<16x128xf32>
      %115 = arith.mulf %75, %114 : vector<16x128xf32>
      %cst_70 = arith.constant 1.000000e+00 : f32
      %116 = vector.broadcast %cst_70 : f32 to vector<16x128xf32>
      %117 = arith.mulf %116, %104 : vector<16x128xf32>
      %118 = vector.broadcast %106 : vector<1x128xf32> to vector<16x128xf32>
      %119 = arith.mulf %118, %117 : vector<16x128xf32>
      %120 = arith.addf %115, %119 : vector<16x128xf32>
      %c0_71 = arith.constant 0 : index
      %c0_72 = arith.constant 0 : index
      %c0_73 = arith.constant 0 : index
      %121 = vector.load %arg9[%c0_71, %c0_72, %c0_73] : memref<1x16x128xf32, #tpu.memory_space<vmem>>, vector<1x16x128xf32>
      %122 = vector.shape_cast %121 : vector<1x16x128xf32> to vector<16x128xf32>
      %123 = vector.shape_cast %120 : vector<16x128xf32> to vector<1x16x128xf32>
      tpu.vector_store %arg9[%c0_71, %c0_72, %c0_73], %123 {strides = array<i32>} : memref<1x16x128xf32, #tpu.memory_space<vmem>>, vector<1x16x128xf32>,
    } else {
    }
    return
  }
  func.func @transform_0(%arg0: i32, %arg1: i32, %arg2: i32) -> (i32, i32, i32) {
    %c0_i32 = arith.constant 0 : i32
    %c0_i32_0 = arith.constant 0 : i32
    return %arg0, %arg1, %c0_i32 : i32, i32, i32
  }
  func.func @transform_1(%arg0: i32, %arg1: i32, %arg2: i32) -> (i32, i32, i32) {
    %c0_i32 = arith.constant 0 : i32
    return %arg0, %arg1, %arg2 : i32, i32, i32
  }
  func.func @transform_2(%arg0: i32, %arg1: i32, %arg2: i32) -> (i32, i32, i32) {
    %c0_i32 = arith.constant 0 : i32
    %c0_i32_0 = arith.constant 0 : i32
    return %arg0, %c0_i32, %arg2 : i32, i32, i32
  }
  func.func @transform_3(%arg0: i32, %arg1: i32, %arg2: i32) -> (i32, i32, i32) {
    %c0_i32 = arith.constant 0 : i32
    %c0_i32_0 = arith.constant 0 : i32
    %c0_i32_1 = arith.constant 0 : i32
    return %arg0, %c0_i32, %c0_i32_0 : i32, i32, i32
  }
  func.func @transform_4(%arg0: i32, %arg1: i32, %arg2: i32) -> (i32, i32, i32) {
    %c0_i32 = arith.constant 0 : i32
    %c0_i32_0 = arith.constant 0 : i32
    %c0_i32_1 = arith.constant 0 : i32
    return %arg0, %c0_i32, %c0_i32_0 : i32, i32, i32
  }
  func.func @transform_5(%arg0: i32, %arg1: i32, %arg2: i32) -> (i32, i32, i32) {
    %c0_i32 = arith.constant 0 : i32
    %c0_i32_0 = arith.constant 0 : i32
    %c0_i32_1 = arith.constant 0 : i32
    return %arg0, %c0_i32, %c0_i32_0 : i32, i32, i32
  }
  func.func @transform_6(%arg0: i32, %arg1: i32, %arg2: i32) -> (i32, i32, i32) {
    %c0_i32 = arith.constant 0 : i32
    %c0_i32_0 = arith.constant 0 : i32
    return %arg0, %arg1, %c0_i32 : i32, i32, i32
  }
}

</mosaic_0001>

<bundles_post_ra>
// kernel: compute_cost_matrices.1
= control target key start
LH: loop header
LB: loop body
LE: loop exit
PB: predicated region body
PF: predicated region fallthrough
CT: control target
= control target key end

     0   :  { %11 = vsyncpa [#allocation7], 0  ;;  %s2001_s0 = inlined_call_operand.vmem [shape: f32[2,16,8], index: 0, kind: input, shape index: {}]   ;;  %s2002_s1 = inlined_call_operand.vmem [shape: bf16[2,16,256], index: 1, kind: input, shape index: {}]   ;;  %s2003_s2 = inlined_call_operand.vmem [shape: bf16[2,128,256], index: 2, kind: input, shape index: {}]   ;;  %s2004_s3 = inlined_call_operand.vmem [shape: f32[2,128,8], index: 3, kind: input, shape index: {}]   ;;  %s2005_s4 = inlined_call_operand.vmem [shape: f32[2,1,128], index: 4, kind: input, shape index: {}]   ;;  %s2006_s5 = inlined_call_operand.vmem [shape: f32[2,1,128], index: 5, kind: input, shape index: {}]   ;;  %s2007_s6 = inlined_call_operand.hbm [shape: f32[2,16,128], index: 6, kind: output, shape index: {}]  }
   0x1   :  { %13 = vsyncpa [#allocation7 + $0x1], 0  ;;  %s1699_s21 = smov 0   ;;  %s1701_s22 = smov 0  }
   0x2   :  { %s1703_s23 = smov 0   ;;  %s1705_s24 = smov 0  }
   0x3   :  { %s1707_s25 = smov 0   ;;  %s1709_s26 = smov 0  }
   0x4 LB: > { %s1250_s27 = sadd.s32 4294967295, %s1657_s26   ;;  %s1251_s28 = sadd.s32 4294967294, %s1657_s26   ;;  %s1657_s26 = sphi %s1709_s26, %s19_s26   ;;  %s1653_s25 = sphi %s1707_s25, %s2016_s25   ;;  %s1649_s24 = sphi %s1705_s24, %s2015_s24   ;;  %s1645_s23 = sphi %s1703_s23, %s2014_s23   ;;  %s1641_s22 = sphi %s1701_s22, %s2013_s22   ;;  %s1637_s21 = sphi %s1699_s21, %s2012_s21  }
   0x5   : > { %s38_s29 = sadd.s32 1, %s1653_s25  ;;  %s211_s30 = sadd.s32 1, %s1645_s23 }
   0x6   : > { %p40_p0 = scmp.ge.s32.totalorder %s38_s29, 2  ;;  %p221_p1 = scmp.ne.s32.totalorder %s1645_s23, %s1641_s22 }
   0x7   : > { %p222_p2 = scmp.eq.s32.totalorder %s1250_s27, 1  ;;  %p227_p3 = scmp.ne.s32.totalorder %s1641_s22, %s1637_s21 }
   0x8   : > { %s2018_s29 = smov (%p40_p0, %s38_s29), 0  ;;  %p228_p5 = scmp.eq.s32.totalorder %s1251_s28, 1 }
   0x9   : > { %p1739_p4 = por %p222_p2, %p221_p1  ;;  %s206_s8 = ssub.s32 %s1653_s25, %s2018_s29 }
   0xa   : > { %p1254_p6 = scmp.ge.s32.totalorder %s1657_s26, 1  ;;  %p209_p7 = scmp.eq.s32.totalorder %s206_s8, 0 }
   0xb   : > { %p1746_p8 = por %p228_p5, %p227_p3  ;;  %p311_p9 = scmp.lt.s32.totalorder %s1657_s26, 3 }
   0xc   : > { %s1752_s10 = scalar_select %p209_p7, %s1645_s23, %s211_s30  }
   0xd   : > { %p312_p10 = pnand %p1254_p6, %p311_p9 }
   0xe   : > { %p380_p11 = scmp.lt.s32.totalorder (!%p312_p10), %s1649_s24, 1  ;;  %vm843_vm0 = vcmask (!%p312_p10), 64512   ;;  %vm436_vm6 = vcmask (!%p312_p10), 7168   ;;  %s1661_s14 = smov (!%p312_p10), [#allocation6]  }
   0xf   : > { %315 = sbr.rel (%p312_p10) target bundleno = 580 (0x244), region = 44  ;;  %vm1866_vm5 = vmpackc.low (!%p312_p10), %vm843_vm0, %vm843_vm0 }
  0x16   : > { %s1756_s11 = scalar_select %p380_p11, %s1649_s24, 1 }
  0x18   : > { %s1304_s12 = sshll.u32 %s1756_s11, 4  ;;  %s1306_s13 = sshll.u32 %s1756_s11, 7 }
  0x19   : > { %s387_s16 = scalar_lea.vmem %s2001_s0, %s1304_s12  ;;  %s402_s19 = scalar_lea.vmem %s2002_s1, %s1304_s12 }
  0x1a   : > { %s1771_s28 = scalar_lea.vmem %s2003_s2, %s1306_s13  ;;  %v441_v0 = vld [vmem:[%s402_s19] sm:$0xff]  ;;  %v1777_v3 = vld [vmem:[%s387_s16 + $0x8] sm:$0xff]  ;;  %s1857_s12 = scalar_lea.vmem %s2004_s3, %s1306_s13 }
  0x1b   : > { %v1773_v1 = vld [vmem:[%s387_s16] sm:$0xff]  ;;  %v1775_v2 = vunpack.c.l.bf16 %v441_v0  ;;  %v1779_v4 = vunpack.c.h.bf16 %v441_v0  ;;  %v442_v6 = vld [vmem:[%s402_s19 + $0x8] sm:$0xff]  ;;  %v847_v7 = vsel %vm843_vm0, %v1777_v3, -inf  ;;  %v1522_v34 = vld [vmem:[%s1771_s28 + $0x14] ss:$8 sps:$4 sm:$0xff]   ;;  %s425_s15 = scalar_lea.vmem %s2006_s5, %s1756_s11  ;;  %s422_s18 = scalar_lea.vmem %s2005_s4, %s1756_s11 }
  0x1c   : > { %v844_v5 = vsel %vm843_vm0, %v1773_v1, -inf  ;;  %v1787_v10 = vunpack.c.l.bf16 %v442_v6  ;;  %v1789_v11 = vunpack.c.h.bf16 %v442_v6  ;;  %v1519_v31 = vld [vmem:[%s1771_s28 + $0x4] ss:$8 sps:$4 sm:$0xff]   ;;  %v1521_v32 = vld [vmem:[%s1771_s28] ss:$8 sps:$4 sm:$0xff]   ;;  %s376_s19 = sand.u32 1, %s1641_s22  }
  0x1d   : > { %845 = vmax.xlane.f32.xlu0 %v844_v5  ;;  %v463_v8 = vand.u32 2147483647, %v1775_v2  ;;  %v464_v9 = vand.u32 2147483647, %v1779_v4  ;;  %vm491_vm1 = vcmp.ge.f32.partialorder %v1775_v2, 0.0  ;;  %vm492_vm2 = vcmp.ge.f32.partialorder %v1779_v4, 0.0  ;;  %752 = vmatprep.subr.bf16.mxu1 %v1519_v31 }
  0x1e   : > { %v465_v14 = vand.u32 2147483647, %v1787_v10  ;;  %v466_v15 = vand.u32 2147483647, %v1789_v11  ;;  %1363 = vmatprep.subr.bf16.mxu0 %v1519_v31  ;;  %vm493_vm3 = vcmp.ge.f32.partialorder %v1787_v10, 0.0  ;;  %753 = vmatpush1.bf16.xpose.msra.mxu1 %v1521_v32  ;;  %vm494_vm4 = vcmp.ge.f32.partialorder %v1789_v11, 0.0 }
  0x1f   : > { %v467_v12 = vsub.f32 0.0, %v463_v8  ;;  %v468_v13 = vsub.f32 0.0, %v464_v9  ;;  %1365 = vmatpush1.bf16.xpose.msra.mxu0 %v1521_v32  ;;  %754 = vmatprep.subr.bf16.mxu1 %v1522_v34  ;;  %v507_v39 = vsub.f32 0.0, %v1775_v2  ;;  %v508_v42 = vsub.f32 0.0, %v1779_v4  ;;  %v1524_v44 = vld [vmem:[%s1771_s28 + $0x10] ss:$8 sps:$4 sm:$0xff]  }
  0x20   : > { %v469_v18 = vsub.f32 0.0, %v465_v14  ;;  %v470_v19 = vsub.f32 0.0, %v466_v15  ;;  %1367 = vmatprep.subr.bf16.mxu0 %v1522_v34  ;;  %v509_v45 = vsub.f32 0.0, %v1787_v10  ;;  %v510_v46 = vsub.f32 0.0, %v1789_v11  ;;  %v1525_v48 = vld [vmem:[%s1771_s28 + $0x24] ss:$8 sps:$4 sm:$0xff]  }
  0x21   : > { %848 = vmax.xlane.f32.xlu0 %v847_v7  ;;  %v471_v16 = vmul.f32 1.442695, %v467_v12  ;;  %v473_v17 = vmul.f32 1.442695, %v468_v13  ;;  %v511_v52 = vmax.f32 %v507_v39, 0.0  ;;  %v512_v55 = vmax.f32 %v508_v42, 0.0 }
  0x22   : > { %v475_v20 = vmul.f32 1.442695, %v469_v18  ;;  %v477_v21 = vmul.f32 1.442695, %v470_v19  ;;  %v513_v58 = vmax.f32 %v509_v45, 0.0  ;;  %v514_v59 = vmax.f32 %v510_v46, 0.0 }
  0x23   : > { %1543 = vpow2.f32 %v471_v16  ;;  %v1527_v15 = vld [vmem:[%s1771_s28 + $0x20] ss:$8 sps:$4 sm:$0xff]   ;;  %v1528_v19 = vld [vmem:[%s1771_s28 + $0x34] ss:$8 sps:$4 sm:$0xff]   ;;  %v1536_v34 = vld [vmem:[%s1771_s28 + $0x50] ss:$8 sps:$4 sm:$0xff]  }
  0x24   : > { %1545 = vpow2.f32 %v473_v17  ;;  %v1533_v32 = vld [vmem:[%s1771_s28 + $0x40] ss:$8 sps:$4 sm:$0xff]   ;;  %s1255_s20 = sshll.u32 %s376_s19, 4  ;;  %s1308_s11 = sshll.u32 %s1649_s24, 8 }
  0x25   : > { %1547 = vpow2.f32 %v475_v20  ;;  %s378_s27 = scalar_lea.vmem [#allocation6], %s1255_s20  ;;  %s1955_s13 = scalar_lea.sflag [#allocation7], %s376_s19 }
  0x26   : > { %1549 = vpow2.f32 %v477_v21  ;;  %755 = vmatpush1.bf16.xpose.msra.mxu1 %v1524_v44 }
  0x27   : > { %1369 = vmatpush1.bf16.xpose.msra.mxu0 %v1524_v44  ;;  %756 = vmatprep.subr.bf16.mxu1 %v1525_v48 }
  0x28   : > { %1371 = vmatprep.subr.bf16.mxu0 %v1525_v48  ;;  %v828_v48 = vld [vmem:[%s1857_s12 + $0x8] sm:$0xff] }
  0x2d   : > { %v1544_v22 = vpop.eup %1543 }
  0x2e   : > { %v1546_v23 = vpop.eup %1545  ;;  %v479_v24 = vadd.f32 1.0, %v1544_v22  ;;  %v495_v30 = vsel %vm491_vm1, 1.0, %v1544_v22  ;;  %757 = vmatpush1.bf16.xpose.msra.mxu1 %v1527_v15 }
  0x2f   : > { %v480_v25 = vadd.f32 1.0, %v1546_v23  ;;  %v1548_v26 = vpop.eup %1547  ;;  %v496_v33 = vsel %vm492_vm2, 1.0, %v1546_v23  ;;  %1373 = vmatpush1.bf16.xpose.msra.mxu0 %v1527_v15  ;;  %758 = vmatprep.subr.bf16.mxu1 %v1528_v19  ;;  %v836_v15 = vld [vmem:[%s1857_s12 + $0x48] sm:$0xff] }
  0x30   : > { %1551 = vrcp.f32 %v479_v24  ;;  %v1550_v27 = vpop.eup %1549  ;;  %v481_v28 = vadd.f32 1.0, %v1548_v26  ;;  %v497_v41 = vsel %vm493_vm3, 1.0, %v1548_v26  ;;  %1375 = vmatprep.subr.bf16.mxu0 %v1528_v19 }
  0x31   : > { %1553 = vrcp.f32 %v480_v25  ;;  %v482_v29 = vadd.f32 1.0, %v1550_v27  ;;  %v498_v43 = vsel %vm494_vm4, 1.0, %v1550_v27 }
  0x32   : > { %1555 = vrcp.f32 %v481_v28 }
  0x33   : > { %1557 = vrcp.f32 %v482_v29 }
  0x34   : > { %1559 = vlog2.f32 %v479_v24 }
  0x35   : > { %1561 = vlog2.f32 %v480_v25 }
  0x36   : > { %1563 = vlog2.f32 %v481_v28 }
  0x37   : > { %1565 = vlog2.f32 %v482_v29  ;;  %v1530_v29 = vld [vmem:[%s1771_s28 + $0x30] ss:$8 sps:$4 sm:$0xff]  }
  0x38   : > { %759 = vmatpush1.bf16.xpose.msra.mxu1 %v1530_v29  ;;  %1377 = vmatpush1.bf16.xpose.msra.mxu0 %v1530_v29  ;;  %v842_v29 = vld [vmem:[%s1857_s12 + $0x78] sm:$0xff] }
  0x3a   : > { %v1552_v35 = vpop.eup %1551 }
  0x3b   : > { %v1554_v36 = vpop.eup %1553  ;;  %v1798_v37 = vmul.f32 %v1552_v35, %v495_v30  ;;  %v1531_v30 = vld [vmem:[%s1771_s28 + $0x44] ss:$8 sps:$4 sm:$0xff]  }
  0x3c   : > { %v504_v38 = vmul.f32 %v1554_v36, %v496_v33  ;;  %v1556_v47 = vpop.eup %1555  ;;  %760 = vmatprep.subr.bf16.mxu1 %v1531_v30  ;;  %1379 = vmatprep.subr.bf16.mxu0 %v1531_v30  ;;  %v1534_v33 = vld [vmem:[%s1771_s28 + $0x54] ss:$8 sps:$4 sm:$0xff]   ;;  %v1537_v35 = vld [vmem:[%s1771_s28 + $0x64] ss:$8 sps:$4 sm:$0xff]  }
  0x3d   : > { %v1558_v50 = vpop.eup %1557  ;;  %v1809_v51 = vmul.f32 %v1556_v47, %v497_v41  ;;  %v527_v7 = vmul.f32 %v1798_v37, %v1798_v37  ;;  %v523_v36 = vsub.f32 1.0, %v1798_v37  ;;  %v1539_v41 = vld [vmem:[%s1771_s28 + $0x60] ss:$8 sps:$4 sm:$0xff]  }
  0x3e   : > { %v812_v40 = vadd.f32 %v504_v38, %v1798_v37  ;;  %v524_v49 = vsub.f32 1.0, %v504_v38  ;;  %v1560_v53 = vpop.eup %1559  ;;  %v1811_v54 = vmul.f32 %v1558_v50, %v498_v43  ;;  %v528_v12 = vmul.f32 %v504_v38, %v504_v38  ;;  %v1540_v43 = vld [vmem:[%s1771_s28 + $0x74] ss:$8 sps:$4 sm:$0xff]   ;;  %v827_v47 = vld [vmem:[%s1857_s12] sm:$0xff] }
  0x3f   : > { %v1562_v56 = vpop.eup %1561  ;;  %v484_v57 = vmul.f32 0.6931472, %v1560_v53  ;;  %v529_v17 = vmul.f32 %v1809_v51, %v1809_v51  ;;  %v535_v39 = vmul.f32 %v523_v36, %v523_v36 }
  0x40   : > { %813 = vadd.xlane.f32.xlu0 %v812_v40  ;;  %v1564_v60 = vpop.eup %1563  ;;  %v1815_v61 = vadd.f32 %v1811_v54, %v1809_v51  ;;  %v486_v62 = vmul.f32 0.6931472, %v1562_v56  ;;  %v671_v63 = vpack.c.bf16 %v1811_v54, %v504_v38  ;;  %v536_v0 = vmul.f32 %v524_v49, %v524_v49  ;;  %761 = vmatpush1.bf16.xpose.msra.mxu1 %v1533_v32 }
  0x41   : > { %v1566_v5 = vpop.eup %1565  ;;  %v515_v6 = vadd.f32 %v511_v52, %v484_v57  ;;  %v488_v8 = vmul.f32 0.6931472, %v1564_v60  ;;  %v530_v21 = vmul.f32 %v1811_v54, %v1811_v54  ;;  %1381 = vmatpush1.bf16.xpose.msra.mxu0 %v1533_v32  ;;  %762 = vmatprep.subr.bf16.mxu1 %v1534_v33  ;;  %v526_v38 = vsub.f32 1.0, %v1811_v54  ;;  %v1542_v52 = vld [vmem:[%s1771_s28 + $0x70] ss:$8 sps:$4 sm:$0xff]   ;;  %s1096_s28 = sshll.u32 %s378_s27, 4  ;;  %s1948_s28 = int_to_ptr.vmem [resolvable:$true] %s1096_s28 }
  0x42   : > { %v516_v9 = vadd.f32 %v512_v55, %v486_v62  ;;  %v490_v13 = vmul.f32 0.6931472, %v1566_v5  ;;  %784 = vmatprep.mubr.bf16.mxu1 %v671_v63  ;;  %1383 = vmatprep.subr.bf16.mxu0 %v1534_v33  ;;  %v525_v40 = vsub.f32 1.0, %v1809_v51  ;;  %v1394_v54 = vpack.c.bf16 %v828_v48, %v827_v47  ;;  %v830_v60 = vld [vmem:[%s1857_s12 + $0x18] sm:$0xff]  ;;  %s1579_s24 = scalar_lea.vmem %s1948_s28, 256 }
  0x43   : > { %v519_v14 = vadd.f32 %v515_v6, %v1775_v2  ;;  %v517_v16 = vadd.f32 %v513_v58, %v488_v8  ;;  %v538_v42 = vmul.f32 %v526_v38, %v526_v38  ;;  %v539_v44 = vmul.f32 %v535_v39, %v515_v6  ;;  %p1580_p12 = scmp.ne.s32.totalorder %s1948_s28, %s1579_s24 }
  0x44   : > { %v520_v18 = vadd.f32 %v516_v9, %v1779_v4  ;;  %v518_v20 = vadd.f32 %v514_v59, %v490_v13  ;;  %v540_v22 = vmul.f32 %v536_v0, %v516_v9  ;;  %v537_v45 = vmul.f32 %v525_v40, %v525_v40  ;;  %v829_v59 = vld [vmem:[%s1857_s12 + $0x10] sm:$0xff] }
  0x45   : > { %v1828_v23 = vmul.f32 %v527_v7, %v519_v14  ;;  %v521_v24 = vadd.f32 %v517_v16, %v1787_v10  ;;  %v670_v62 = vpack.c.bf16 %v1809_v51, %v1798_v37  ;;  %v1400_v6 = vpack.c.bf16 %v830_v60, %v829_v59  ;;  %v831_v37 = vld [vmem:[%s1857_s12 + $0x20] sm:$0xff]  ;;  %v832_v51 = vld [vmem:[%s1857_s12 + $0x28] sm:$0xff]  ;;  %v833_v9 = vld [vmem:[%s1857_s12 + $0x30] sm:$0xff]  ;;  %p1581_p13 = pnand %p1580_p12, %p1739_p4 }
  0x46   : > { %v532_v2 = vmul.f32 %v528_v12, %v520_v18  ;;  %v522_v25 = vadd.f32 %v518_v20, %v1789_v11  ;;  %v542_v46 = vmul.f32 %v538_v42, %v518_v20  ;;  %v541_v50 = vmul.f32 %v537_v45, %v517_v16  ;;  %v834_v12 = vld [vmem:[%s1857_s12 + $0x38] sm:$0xff]  ;;  %v835_v14 = vld [vmem:[%s1857_s12 + $0x40] sm:$0xff] }
  0x47   : > { %v1832_v26 = vmul.f32 %v529_v17, %v521_v24  ;;  %v543_v49 = vadd.f32 %v539_v44, %v1828_v23  ;;  %v1406_v8 = vpack.c.bf16 %v832_v51, %v831_v37  ;;  %v1412_v13 = vpack.c.bf16 %v834_v12, %v833_v9  ;;  %v837_v17 = vld [vmem:[%s1857_s12 + $0x50] sm:$0xff]  ;;  %v838_v18 = vld [vmem:[%s1857_s12 + $0x58] sm:$0xff]  ;;  %p1582_p0 = pneg %p1581_p13 }
  0x48   : > { %v799_v4 = vadd.f32 %v532_v2, %v1828_v23  ;;  %v1835_v27 = vmul.f32 %v530_v21, %v522_v25  ;;  %v544_v28 = vadd.f32 %v540_v22, %v532_v2  ;;  %763 = vmatpush1.bf16.xpose.msra.mxu1 %v1536_v34  ;;  %v1418_v16 = vpack.c.bf16 %v836_v15, %v835_v14 }
  0x49   : > { %1385 = vmatpush1.bf16.xpose.msra.mxu0 %v1536_v34  ;;  %764 = vmatprep.subr.bf16.mxu1 %v1537_v35  ;;  %v547_v56 = vmul.f32 0.25, %v543_v49  ;;  %v545_v57 = vadd.f32 %v541_v50, %v1832_v26  ;;  %v1424_v19 = vpack.c.bf16 %v838_v18, %v837_v17  ;;  %v1660_v33 = vmov 0  }
  0x4a   : > { %800 = vadd.xlane.f32.xlu0 %v799_v4  ;;  %v1839_v10 = vadd.f32 %v1835_v27, %v1832_v26  ;;  %v548_v11 = vmul.f32 0.25, %v544_v28  ;;  %1387 = vmatprep.subr.bf16.mxu0 %v1537_v35  ;;  %v546_v53 = vadd.f32 %v542_v46, %v1835_v27  ;;  %v840_v28 = vld [vmem:[%s1857_s12 + $0x68] sm:$0xff] }
  0x4b   : > { %v551_v63 = vsub.f32 %v547_v56, %v1828_v23  ;;  %v549_v0 = vmul.f32 0.25, %v545_v57  ;;  %1517 = vset.pattern.permute.xlu0 %v1660_v33  ;;  %1518 = vset.pattern.permute.xlu1 %v1660_v33 }
  0x4c   : > { %v552_v31 = vsub.f32 %v548_v11, %v532_v2  ;;  %v550_v58 = vmul.f32 0.25, %v546_v53 }
  0x4d   : > { %v553_v7 = vsub.f32 %v549_v0, %v1832_v26 }
  0x4e   : > { %653 = vmatprep.mubr.f32.mxu0 %v552_v31  ;;  %v554_v5 = vsub.f32 %v550_v58, %v1835_v27  ;;  %v839_v27 = vld [vmem:[%s1857_s12 + $0x60] sm:$0xff]  ;;  %v1659_v31 = vmov 0.0  }
  0x4f   : > { %v1430_v11 = vpack.c.bf16 %v840_v28, %v839_v27  ;;  %439 = vst.msk [vmem:[#allocation5] sm:$0xff] %vm436_vm6, %v1659_v31  ;;  %437 = vst.msk [vmem:[#allocation4] sm:$0xff] %vm436_vm6, %v1659_v31 }
  0x50   : > { %765 = vmatpush1.bf16.xpose.msra.mxu1 %v1539_v41  ;;  %438 = vst.msk [vmem:[#allocation4 + $0x8] sm:$0xff] %vm436_vm6, %v1659_v31  ;;  %440 = vst.msk [vmem:[#allocation5 + $0x8] sm:$0xff] %vm436_vm6, %v1659_v31 }
  0x51   : > { %1389 = vmatpush1.bf16.xpose.msra.mxu0 %v1539_v41  ;;  %766 = vmatprep.subr.bf16.mxu1 %v1540_v43 }
  0x52   : > { %1391 = vmatprep.subr.bf16.mxu0 %v1540_v43 }
  0x56   : > { %v797_v35 = vld [vmem:[#allocation4] sm:$0xff] }
  0x57   : > { %v811_v41 = vld [vmem:[#allocation5 + $0x8] sm:$0xff]  ;;  %v798_v44 = vld [vmem:[#allocation4 + $0x8] sm:$0xff] }
  0x58   : > { %767 = vmatpush1.bf16.xpose.msra.mxu1 %v1542_v52 }
  0x59   : > { %1393 = vmatpush1.bf16.xpose.msra.mxu0 %v1542_v52 }
  0x5a   : > { %1396 = vmatprep.subr.msk.bf16.mxu0 %vm1866_vm5, %v1394_v54 }
  0x5f   : > { %785 = vmatmul.mubr.bf16.vlgmr.msra.gmra.mrb[0].mxu1 %v670_v62 }
  0x60   : > { %654 = vmatmul.mubr.f32.vlgmr.msra.gmra.mrb[0].mxu0 %v551_v63 }
  0x61   : > { %1399 = vmatpush3.bf16.xpose.msk.msra.mxu0 %vm1866_vm5, %v1394_v54  ;;  %658 = vmatprep.mubr.f32.mxu0 %v554_v5 }
  0x62   : > { %1402 = vmatprep.subr.msk.bf16.mxu0 %vm1866_vm5, %v1400_v6 }
  0x64   : > { %659 = vmatmul.mubr.f32.gmra.mrb[2].mxu0 %v553_v7 }
  0x69   : > { %1405 = vmatpush3.bf16.xpose.msk.msra.mxu0 %vm1866_vm5, %v1400_v6  ;;  %v1298_v6 = vld [vmem:[%s425_s15] ss:$0 sm:$0xff]  ;;  %s1583_s15 = sshll.u32 %s1661_s14, 4  ;;  %s1584_s15 = int_to_ptr.vmem [resolvable:$false] %s1583_s15 }
  0x6a   : > { %1408 = vmatprep.subr.msk.bf16.mxu0 %vm1866_vm5, %v1406_v8  ;;  %s1585_s16 = scalar_lea.vmem %s1584_s15, 512  ;;  %p1586_p1 = scmp.lt.s32.totalorder %s1948_s28, %s1584_s15 }
  0x6b   : > { %p1587_p2 = scmp.lt.s32.totalorder %s1585_s16, %s1579_s24 }
  0x6d   : > { %p1588_p3 = por %p1587_p2, %p1586_p1 }
  0x6f   : > { %p1589_p5 = pnand %p1588_p3, %p1582_p0 }
  0x71   : > { %1411 = vmatpush3.bf16.xpose.msk.msra.mxu0 %vm1866_vm5, %v1406_v8 }
  0x72   : > { %1414 = vmatprep.subr.msk.bf16.mxu0 %vm1866_vm5, %v1412_v13 }
  0x79   : > { %1417 = vmatpush3.bf16.xpose.msk.msra.mxu0 %vm1866_vm5, %v1412_v13 }
  0x7a   : > { %1420 = vmatprep.subr.msk.bf16.mxu0 %vm1866_vm5, %v1418_v16 }
  0x81   : > { %1423 = vmatpush3.bf16.xpose.msk.msra.mxu0 %vm1866_vm5, %v1418_v16 }
  0x82   : > { %1426 = vmatprep.subr.msk.bf16.mxu0 %vm1866_vm5, %v1424_v19 }
  0x89   : > { %1429 = vmatpush3.bf16.xpose.msk.msra.mxu0 %vm1866_vm5, %v1424_v19 }
  0x8a   : > { %1432 = vmatprep.subr.msk.bf16.mxu0 %vm1866_vm5, %v1430_v11 }
  0x91   : > { %1435 = vmatpush3.bf16.xpose.msk.msra.mxu0 %vm1866_vm5, %v1430_v11 }
  0xaa   : > { %v846_v20 = vpop.xlane.xlu0 %845 }
  0xab   : > { %v850_v21 = vsub.f32 %v1773_v1, %v846_v20 }
  0xad   : > { %v852_v22 = vmul.f32 1.442695, %v850_v21 }
  0xae   : > { %v849_v23 = vpop.xlane.xlu0 %848 }
  0xaf   : > { %1567 = vpow2.f32 %v852_v22  ;;  %v851_v24 = vsub.f32 %v1777_v3, %v849_v23  ;;  %v841_v3 = vld [vmem:[%s1857_s12 + $0x70] sm:$0xff]  ;;  %s1953_s12 = scalar_lea.hbm %s2007_s6, %s1308_s11 }
  0xb0   : > { %v1436_v30 = vpack.c.bf16 %v842_v29, %v841_v3  ;;  %v1056_v3 = vld [vmem:[%s422_s18] sm:$0x1] }
  0xb1   : > { %v854_v2 = vmul.f32 1.442695, %v851_v24  ;;  %v1057_v29 = vsub.f32 1.0, %v1056_v3 }
  0xb2   : > { %1438 = vmatprep.subr.msk.bf16.mxu0 %vm1866_vm5, %v1436_v30 }
  0xb3   : > { %1569 = vpow2.f32 %v854_v2  ;;  %1441 = vmatpush3.bf16.xpose.msk.msra.mxu0 %vm1866_vm5, %v1436_v30  ;;  %v1061_v30 = vlaneseq  ;;  %v1058_v31 = vmul.f32 2.0, %v1057_v29 }
  0xb9   : > { %v1568_v25 = vpop.eup %1567 }
  0xba   : > { %v856_v26 = vsel %vm843_vm0, %v1568_v25, 0.0 }
  0xbb   : > { %857 = vadd.xlane.f32.xlu1 %v856_v26 }
  0xbd   : > { %v1570_v4 = vpop.eup %1569 }
  0xbe   : > { %v859_v1 = vsel %vm843_vm0, %v1570_v4, 0.0 }
  0xbf   : > { %860 = vadd.xlane.f32.xlu1 %v859_v1 }
  0xc3   : > { %816 = vadd.xlane.f32.xlu1 %v1815_v61  ;;  %v810_v61 = vld [vmem:[#allocation5] sm:$0xff] }
  0xc7   : > { %803 = vadd.xlane.f32.xlu1 %v1839_v10 }
  0xcd   : > { %v814_v10 = vpop.xlane.xlu0 %813 }
  0xce   : > { %v818_v32 = vadd.f32 %v814_v10, %v810_v61  ;;  %v1062_v61 = vshrl.u32 %v1061_v30, 7  ;;  %v1059_v10 = vadd.f32 %v1058_v31, %v1056_v3 }
  0xd0   : > { %820 = vst.msk [vmem:[#allocation5] sm:$0xff] %vm436_vm6, %v818_v32  ;;  %v1063_v32 = vsub.s32 0, %v1062_v61 }
  0xd2   : > { %v1064_v33 = vrot.slane %v1059_v10, %v1063_v32 }
  0xd7   : > { %v1024_v34 = vld [vmem:[#allocation5] sm:$0xff]  ;;  %v801_v36 = vpop.xlane.xlu0 %800 }
  0xd8   : > { %1028 = vperm.xlu0 %1517, %v1024_v34   ;;  %v805_v38 = vadd.f32 %v801_v36, %v797_v35  ;;  %v1072_v34 = vrot.slane %v1056_v3, %v1063_v32 }
  0xda   : > { %808 = vst.msk [vmem:[#allocation4] sm:$0xff] %vm436_vm6, %v805_v38 }
  0xe1   : > { %v997_v52 = vld [vmem:[#allocation4] sm:$0xff] }
  0xe2   : > { %v999_v54 = vmul.f32 0.75, %v997_v52 }
 0x132   : > { %v786_v57 = vpop.f32.mrb[0].mxu1 }
 0x133   : > { %v655_v58 = vpop.f32.mrb[0].mxu0  ;;  %v788_v60 = vpop.f32.mrb[1].mxu1  ;;  %v1020_v8 = vmul.f32 2.0, %v786_v57 }
 0x134   : > { %v657_v59 = vpop.f32.mrb[1].mxu0  ;;  %v789_v62 = vpop.f32.mrb[2].mxu1 }
 0x135   : > { %v791_v63 = vpop.f32.mrb[3].mxu1  ;;  %v1022_v9 = vadd.f32 1.0, %v1020_v8  ;;  %v1021_v21 = vmul.f32 2.0, %v789_v62 }
 0x137   : > { %v660_v0 = vpop.f32.mrb[2].mxu0 }
 0x138   : > { %v662_v5 = vpop.f32.mrb[3].mxu0 }
 0x148   : > { %v858_v39 = vpop.xlane.xlu1 %857 }
 0x149   : > { %1571 = vrcp.f32 %v858_v39 }
 0x14c   : > { %v861_v40 = vpop.xlane.xlu1 %860 }
 0x14d   : > { %1573 = vrcp.f32 %v861_v40 }
 0x150   : > { %v817_v42 = vpop.xlane.xlu1 %816 }
 0x151   : > { %v819_v43 = vadd.f32 %v817_v42, %v811_v41 }
 0x153   : > { %v1572_v45 = vpop.eup %1571  ;;  %821 = vst.msk [vmem:[#allocation5 + $0x8] sm:$0xff] %vm436_vm6, %v819_v43 }
 0x154   : > { %v863_v46 = vmul.f32 %v1572_v45, %v1568_v25  ;;  %v804_v47 = vpop.xlane.xlu1 %803  ;;  %v1023_v25 = vadd.f32 1.0, %v1021_v21 }
 0x155   : > { %v806_v48 = vadd.f32 %v804_v47, %v798_v44 }
 0x156   : > { %1359 = vmatprep.mubr.msk.f32.mxu0 %vm843_vm0, %v863_v46 }
 0x157   : > { %v1574_v49 = vpop.eup %1573  ;;  %809 = vst.msk [vmem:[#allocation4 + $0x8] sm:$0xff] %vm436_vm6, %v806_v48  ;;  %v1029_v7 = vpop.permute.xlu0 %1028 }
 0x158   : > { %v865_v50 = vmul.f32 %v1574_v49, %v1570_v4  ;;  %v1042_v37 = vadd.f32 %v1298_v6, %v1029_v7 }
 0x15a   : > { %1360 = vmatmul.mubr.msk.f32.vlgmr.msra.gmra.mrb[4].mxu0 %vm843_vm0, %v865_v50  ;;  %v1025_v53 = vld [vmem:[#allocation5 + $0x8] sm:$0xff]  ;;  %v1044_v51 = vadd.f32 1.0, %v1042_v37 }
 0x15b   : > { %1033 = vperm.xlu1 %1518, %v1025_v53  }
 0x15c   : > { %1575 = vrcp.f32 %v1044_v51 }
 0x15e   : > { %v998_v55 = vld [vmem:[#allocation4 + $0x8] sm:$0xff] }
 0x15f   : > { %1005 = vperm.xlu1 %1518, %v999_v54   ;;  %v1000_v56 = vmul.f32 0.75, %v998_v55 }
 0x163   : > { %1010 = vperm.xlu1 %1518, %v1000_v56  }
 0x166   : > { %v1576_v12 = vpop.eup %1575 }
 0x167   : > { %v1047_v16 = vmul.f32 %v1576_v12, %v1022_v9 }
 0x169   : > { %v1050_v19 = vsub.f32 1.0, %v1047_v16 }
 0x1da   : > { %v1034_v13 = vpop.permute.xlu1 %1033 }
 0x1db   : > { %v1043_v14 = vadd.f32 %v1298_v6, %v1034_v13 }
 0x1dd   : > { %v1045_v15 = vadd.f32 1.0, %v1043_v14 }
 0x1de   : > { %v1006_v17 = vpop.permute.xlu1 %1005 }
 0x1df   : > { %1577 = vrcp.f32 %v1045_v15  ;;  %v1013_v18 = vadd.f32 %v1006_v17, %v655_v58 }
 0x1e1   : > { %v1015_v20 = vmul.f32 0.00390625, %v1013_v18 }
 0x1e2   : > { %v1011_v22 = vpop.permute.xlu1 %1010 }
 0x1e3   : > { %v1052_v23 = vmul.f32 20.0, %v1015_v20  ;;  %v1014_v24 = vadd.f32 %v1011_v22, %v660_v0 }
 0x1e5   : > { %v1054_v2 = vadd.f32 %v1052_v23, %v1050_v19  ;;  %v1016_v26 = vmul.f32 0.00390625, %v1014_v24 }
 0x1e7   : > { %v1053_v27 = vmul.f32 20.0, %v1016_v26  ;;  %v1074_v42 = vmul.f32 %v1072_v34, %v1054_v2 }
 0x1e9   : > { %v1578_v4 = vpop.eup %1577 }
 0x1ea   : > { %v1049_v1 = vmul.f32 %v1578_v4, %v1023_v25 }
 0x1ec   : > { %v1051_v28 = vsub.f32 1.0, %v1049_v1 }
 0x1ee   : > { %v1055_v11 = vadd.f32 %v1053_v27, %v1051_v28 }
 0x1f0   : > { %v1075_v40 = vmul.f32 %v1072_v34, %v1055_v11 }
 0x22d   : > { %v1361_v35 = vpop.f32.mrb[4].mxu0 }
 0x22e   : > { %v996_v36 = vsub.f32 0.0, %v1361_v35  ;;  %v986_v38 = vpop.f32.mrb[5].mxu0 }
 0x22f   : > { %v995_v39 = vsub.f32 0.0, %v986_v38 }
 0x230   : > { %v1067_v41 = vmul.f32 %v1064_v33, %v996_v36 }
 0x231   : > { %v1066_v43 = vmul.f32 %v1064_v33, %v995_v39 }
 0x232   : > { %v1077_v44 = vadd.f32 %v1075_v40, %v1067_v41 }
 0x233   : > { %v1076_v45 = vadd.f32 %v1074_v42, %v1066_v43 }
 0x234   : > { %1079 = vst [vmem:[%s378_s27 + $0x8] sm:$0xff] %v1077_v44 }
 0x235   : > { %1078 = vst [vmem:[%s378_s27] sm:$0xff] %v1076_v45 }
 0x236   : > { %1592 = shalt.err (!%p1589_p5)
}
 0x237   : > { %s1593_s17 = scalar_lea.hbm %s1953_s12, 256  ;;  %s1597_s20 = scalar_lea.hbm %s2007_s6, 512 }
 0x238   : > { %p1594_p6 = scmp.ne.s32.totalorder %s1953_s12, %s1593_s17  ;;  %p1598_p10 = scmp.lt.u32.totalorder %s1953_s12, %s2007_s6 }
 0x239   : > { %p1599_p11 = scmp.lt.u32.totalorder %s1597_s20, %s1593_s17  ;;  %p1601_p13 = scmp.lt.u32.totalorder %s1593_s17, %s1953_s12 }
 0x23a   : > { %p1595_p7 = pnand %p1594_p6, %p1739_p4 }
 0x23b   : > { %p1600_p12 = por %p1599_p11, %p1598_p10 }
 0x23c   : > { %p1596_p9 = pneg %p1595_p7 }
 0x23d   : > { %p1602_p0 = por %p1601_p13, %p1600_p12 }
 0x23f   : > { %p1603_p1 = pnand %p1602_p0, %p1596_p9 }
 0x241   : > { %1606 = shalt.err (!%p1603_p1)
}
 0x242   : > { %s1662_s30 = smov 128   ;;  %s1663_s8 = smov 8  }
 0x243   : > { %1458 = dma.vmem_to_hbm [thread:$0]  (%p1739_p4), %s1948_s28, 256, %s1953_s12, %s1955_s13, %s1662_s30, %s1662_s30, %s1663_s8  }
 0x244 PF: > { %p1464_p2 = scmp.ge.s32.totalorder %s1657_s26, 2  ;;  %s1111_s24 = sand.u32 1, %s1637_s21  }
 0x245   : > { %s1112_s14 = scalar_lea.sflag [#allocation7], %s1111_s24 }
 0x246   : > { %p1461_p3 = pnand %p1464_p2, %p1746_p8 }
 0x248   : > { %1632 = dma.done.wait (!%p1461_p3), %s1112_s14, 256  }
 0x249   : > { %1634 = vsyncadd (!%p1461_p3), %s1112_s14, 4294967040  ;;  %s19_s26 = sadd.s32 1, %s1657_s26   ;;  %s2012_s21 = smov %s1641_s22 }
 0x24a   : > { %p16_p5 = scmp.ge.s32.totalorder %s19_s26, 4   ;;  %s2013_s22 = smov %s1645_s23 }
 0x24b   : > { %s2014_s23 = smov %s1752_s10  ;;  %s2015_s24 = smov %s1653_s25 }
 0x24c   : > { %s2016_s25 = smov %s2018_s29  ;;  %18 = sbr.rel (!%p16_p5) target bundleno = 4 (0x4), region = 102 }
 0x253   :  { %1117 = vsyncpa [#allocation7], 1 }
 0x254   :  { %1119 = vsyncpa [#allocation7 + $0x1], 1 }

</bundles_post_ra>
